<compile_context>
chip_gen: v6e
topology: v6e:2x2x1
jax: 0.10.0
libtpu: 0.0.40
codegen_flags: <defaults>
</compile_context>

<pallas_src>
import functools

import jax
import jax.numpy as jnp
from jax import lax
from jax.experimental import pallas as pl
from jax.experimental.pallas import tpu as pltpu

_LANES = 128
_SUBLANES = 8
_TILE = _SUBLANES * _LANES            # one (8,128) f32 vreg tile = 1024 elems
_NCORES = 2                           # leading "parallel" axis (v7x megacore)
_MAX_GROUPS_PER_BLOCK = 1024          # 4 MiB f32 per input per grid step
_BCE_PAD = 1e30                       # softplus(-1e30) == 0 exactly in f32
_VMEM_LIMIT_BYTES = 32 * 1024 * 1024  # covers 3 streams x 2 bufs x 4 MiB


def _ceil_div(a, b):
    return -(-a // b)


def _fused_kernel(real_ref, fake_ref, pred_ref, l1_out_ref, bce_out_ref,
                  l1_acc, bce_acc, *, k_l1, chunk_l1, k_bce, chunk_bce):
    """One grid step: accumulate L1 and BCE partial sums for this core."""
    i = pl.program_id(1)

    @pl.when(i == 0)
    def _():
        l1_acc[...] = jnp.zeros_like(l1_acc)
        bce_acc[...] = jnp.zeros_like(bce_acc)

    # --- L1 stream: sum |real - fake| (pad elements are 0 - 0 = 0) --------
    def l1_body(j, carry):
        off = pl.multiple_of(j * chunk_l1, chunk_l1)
        r = real_ref[pl.ds(off, chunk_l1), :, :].astype(jnp.float32)
        f = fake_ref[pl.ds(off, chunk_l1), :, :].astype(jnp.float32)
        return carry + jnp.sum(jnp.abs(r - f), axis=0)

    trips_l1 = k_l1 // chunk_l1
    l1_acc[...] += lax.fori_loop(
        0, trips_l1, l1_body,
        jnp.zeros((_SUBLANES, _LANES), jnp.float32),
        unroll=min(8, trips_l1))

    # --- BCE stream: sum softplus(-pred), i.e. BCE-with-logits vs ones ----
    # Stable form: max(-x,0) + log1p(exp(-|x|)); pad value +1e30 -> exactly 0.
    def bce_body(j, carry):
        off = pl.multiple_of(j * chunk_bce, chunk_bce)
        x = pred_ref[pl.ds(off, chunk_bce), :, :].astype(jnp.float32)
        sp = jnp.maximum(-x, 0.0) + jnp.log1p(jnp.exp(-jnp.abs(x)))
        return carry + jnp.sum(sp, axis=0)

    trips_bce = k_bce // chunk_bce
    bce_acc[...] += lax.fori_loop(
        0, trips_bce, bce_body,
        jnp.zeros((_SUBLANES, _LANES), jnp.float32),
        unroll=min(8, trips_bce))

    # Lane-dense per-core partial writeback (no in-kernel cross-lane reduce).
    @pl.when(i == pl.num_programs(1) - 1)
    def _():
        l1_out_ref[...] = l1_acc[...].reshape(1, _SUBLANES, _LANES)
        bce_out_ref[...] = bce_acc[...].reshape(1, _SUBLANES, _LANES)


def _largest_chunk(k):
    for c in (8, 4, 2, 1):
        if k % c == 0:
            return c
    return 1


def _plan_steps(n):
    groups = _ceil_div(max(n, 1), _TILE)
    per_core = _ceil_div(groups, _NCORES)
    return _ceil_div(per_core, _MAX_GROUPS_PER_BLOCK)


def _block_groups(n, steps):
    groups = _ceil_div(max(n, 1), _TILE)
    per_core = _ceil_div(groups, _NCORES)
    return _ceil_div(per_core, steps)


def _to_slab(x, k, steps, pad_value):
    """Flatten to a lane-dense (NCORES*steps*k, 8, 128) slab.

    When the element count already matches (common for image tensors) this is
    a free reshape; otherwise a minimal tail pad with `pad_value` is added.
    """
    flat = x.reshape(-1)
    padded = _NCORES * steps * k * _TILE
    if padded != flat.shape[0]:
        # TODO(synk): replace this pad (a full HBM rewrite of the operand when
        # sizes are not tile-aligned) with in-kernel tail masking driven by a
        # scalar-prefetched valid-element count.
        flat = jnp.pad(flat, (0, padded - flat.shape[0]),
                       constant_values=pad_value)
    return flat.reshape(-1, _SUBLANES, _LANES)


@functools.partial(jax.jit, static_argnames=("alpha",))
def generator_loss(real, fake, fake_pred, alpha=100.0):
    assert real.shape == fake.shape, "real and fake must have the same shape"
    # TODO(synk): stream bf16 inputs natively as (groups, 16, 128) slabs to
    # halve HBM bytes instead of up-casting here (no-op for f32 inputs).
    real = real.astype(jnp.float32)
    fake = fake.astype(jnp.float32)
    fake_pred = fake_pred.astype(jnp.float32)

    n_l1 = real.size
    n_bce = fake_pred.size

    # Shared grid: steps chosen so the larger stream stays within 4 MiB blocks.
    steps = max(_plan_steps(n_l1), _plan_steps(n_bce))
    k_l1 = _block_groups(n_l1, steps)
    k_bce = _block_groups(n_bce, steps)
    chunk_l1 = _largest_chunk(k_l1)
    chunk_bce = _largest_chunk(k_bce)

    real3d = _to_slab(real, k_l1, steps, 0.0)
    fake3d = _to_slab(fake, k_l1, steps, 0.0)
    pred3d = _to_slab(fake_pred, k_bce, steps, _BCE_PAD)

    kernel = functools.partial(_fused_kernel, k_l1=k_l1, chunk_l1=chunk_l1,
                               k_bce=k_bce, chunk_bce=chunk_bce)

    def stream_spec(k):
        return pl.BlockSpec((k, _SUBLANES, _LANES),
                            lambda c, i: (c * steps + i, 0, 0))

    part_spec = pl.BlockSpec((1, _SUBLANES, _LANES), lambda c, i: (c, 0, 0))
    part_shape = jax.ShapeDtypeStruct((_NCORES, _SUBLANES, _LANES),
                                      jnp.float32)

    l1_parts, bce_parts = pl.pallas_call(
        kernel,
        out_shape=(part_shape, part_shape),
        grid_spec=pltpu.PrefetchScalarGridSpec(
            num_scalar_prefetch=0,
            grid=(_NCORES, steps),
            in_specs=[stream_spec(k_l1), stream_spec(k_l1),
                      stream_spec(k_bce)],
            out_specs=(part_spec, part_spec),
            scratch_shapes=[pltpu.VMEM((_SUBLANES, _LANES), jnp.float32),
                            pltpu.VMEM((_SUBLANES, _LANES), jnp.float32)],
        ),
        compiler_params=pltpu.CompilerParams(
            dimension_semantics=("parallel", "arbitrary"),
            vmem_limit_bytes=_VMEM_LIMIT_BYTES),
    )(real3d, fake3d, pred3d)

    # Tiny final reduce of the lane-dense per-core partials in plain XLA.
    bce_mean = jnp.sum(bce_parts) / jnp.float32(n_bce)
    l1_mean = jnp.sum(l1_parts) / jnp.float32(n_l1)
    return bce_mean + jnp.float32(alpha) * l1_mean


def _reference_loss(real, fake, fake_pred, alpha=100.0):
    x = fake_pred.astype(jnp.float32)
    bce = jnp.mean(jnp.maximum(-x, 0.0) + jnp.log1p(jnp.exp(-jnp.abs(x))))
    l1 = jnp.mean(jnp.abs(real.astype(jnp.float32) - fake.astype(jnp.float32)))
    return bce + alpha * l1


if __name__ == "__main__":
    key = jax.random.PRNGKey(0)
    k1, k2, k3 = jax.random.split(key, 3)

    # NCHW shapes consistent with an image-GAN generator loss.
    real = jax.random.normal(k1, (2, 4, 16, 16), dtype=jnp.float32)
    fake = jax.random.normal(k2, (2, 4, 16, 16), dtype=jnp.float32)
    # Patch-discriminator logits over the fake image.
    fake_pred = jax.random.normal(k3, (2, 1, 16, 16), dtype=jnp.float32)

    loss = generator_loss(real, fake, fake_pred, alpha=100.0)
    loss = jax.block_until_ready(loss)

    ref = _reference_loss(real, fake, fake_pred, alpha=100.0)
    assert jnp.allclose(loss, ref, rtol=1e-5, atol=1e-5), (loss, ref)

    print("KERNEL_OK")
</pallas_src>

<mosaic_0001>
module attributes {stable_mosaic.version = 11 : i64} {
  func.func @_fused_kernel(%arg0: i32, %arg1: i32, %arg2: memref<1x8x128xf32, #tpu.memory_space<vmem>>, %arg3: memref<1x8x128xf32, #tpu.memory_space<vmem>>, %arg4: memref<1x8x128xf32, #tpu.memory_space<vmem>>, %arg5: memref<1x8x128xf32, #tpu.memory_space<vmem>>, %arg6: memref<1x8x128xf32, #tpu.memory_space<vmem>>, %arg7: memref<8x128xf32, #tpu.memory_space<vmem>>, %arg8: memref<8x128xf32, #tpu.memory_space<vmem>>) attributes {dimension_semantics = [#tpu.dimension_semantics<parallel>, #tpu.dimension_semantics<arbitrary>], iteration_bounds = array<i64: 2, 1>, scalar_prefetch = 0 : i64, scratch_operands = 2 : i64, tpu.core_type = #tpu.core_type<tc>, window_params = [{transform_indices = @transform_0, window_bounds = array<i64: 1, 8, 128>}, {transform_indices = @transform_1, window_bounds = array<i64: 1, 8, 128>}, {transform_indices = @transform_2, window_bounds = array<i64: 1, 8, 128>}, {transform_indices = @transform_3, window_bounds = array<i64: 1, 8, 128>}, {transform_indices = @transform_4, window_bounds = array<i64: 1, 8, 128>}]} {
    %c0_i32 = arith.constant 0 : i32
    %0 = arith.cmpi eq, %arg1, %c0_i32 : i32
    %1 = arith.extui %0 : i1 to i32
    %c0_i32_0 = arith.constant 0 : i32
    %2 = arith.cmpi ne, %1, %c0_i32_0 : i32
    scf.if %2 {
      %cst_27 = arith.constant 0.000000e+00 : f32
      %40 = vector.broadcast %cst_27 : f32 to vector<8x128xf32>
      %c0_28 = arith.constant 0 : index
      %c0_29 = arith.constant 0 : index
      %41 = vector.load %arg7[%c0_28, %c0_29] : memref<8x128xf32, #tpu.memory_space<vmem>>, vector<8x128xf32>
      tpu.vector_store %arg7[%c0_28, %c0_29], %40 {strides = array<i32>} : memref<8x128xf32, #tpu.memory_space<vmem>>, vector<8x128xf32>,
      %cst_30 = arith.constant 0.000000e+00 : f32
      %42 = vector.broadcast %cst_30 : f32 to vector<8x128xf32>
      %c0_31 = arith.constant 0 : index
      %c0_32 = arith.constant 0 : index
      %43 = vector.load %arg8[%c0_31, %c0_32] : memref<8x128xf32, #tpu.memory_space<vmem>>, vector<8x128xf32>
      tpu.vector_store %arg8[%c0_31, %c0_32], %42 {strides = array<i32>} : memref<8x128xf32, #tpu.memory_space<vmem>>, vector<8x128xf32>,
    } else {
    }
    %c0 = arith.constant 0 : index
    %c0_1 = arith.constant 0 : index
    %3 = vector.load %arg7[%c0, %c0_1] : memref<8x128xf32, #tpu.memory_space<vmem>>, vector<8x128xf32>
    %cst = arith.constant 0.000000e+00 : f32
    %4 = vector.broadcast %cst : f32 to vector<8x128xf32>
    %c0_i32_2 = arith.constant 0 : i32
    %c1_i32 = arith.constant 1 : i32
    %5 = arith.muli %c0_i32_2, %c1_i32 : i32
    %6 = tpu.assume_multiple %5, 1 : i32
    %7 = arith.index_cast %6 : i32 to index
    %c0_3 = arith.constant 0 : index
    %c0_4 = arith.constant 0 : index
    %8 = vector.load %arg2[%7, %c0_3, %c0_4] : memref<1x8x128xf32, #tpu.memory_space<vmem>>, vector<1x8x128xf32>
    %9 = arith.index_cast %6 : i32 to index
    %c0_5 = arith.constant 0 : index
    %c0_6 = arith.constant 0 : index
    %10 = vector.load %arg3[%9, %c0_5, %c0_6] : memref<1x8x128xf32, #tpu.memory_space<vmem>>, vector<1x8x128xf32>
    %11 = arith.subf %8, %10 : vector<1x8x128xf32>
    %12 = math.absf %11 : vector<1x8x128xf32>
    %cst_7 = arith.constant dense<0.000000e+00> : vector<8x128xf32>
    %13 = vector.multi_reduction <add>, %12, %cst_7 [0] : vector<1x8x128xf32> to vector<8x128xf32>
    %14 = arith.addf %4, %13 : vector<8x128xf32>
    %c1_i32_8 = arith.constant 1 : i32
    %15 = arith.addf %3, %14 : vector<8x128xf32>
    %c0_9 = arith.constant 0 : index
    %c0_10 = arith.constant 0 : index
    %16 = vector.load %arg7[%c0_9, %c0_10] : memref<8x128xf32, #tpu.memory_space<vmem>>, vector<8x128xf32>
    tpu.vector_store %arg7[%c0_9, %c0_10], %15 {strides = array<i32>} : memref<8x128xf32, #tpu.memory_space<vmem>>, vector<8x128xf32>,
    %c0_11 = arith.constant 0 : index
    %c0_12 = arith.constant 0 : index
    %17 = vector.load %arg8[%c0_11, %c0_12] : memref<8x128xf32, #tpu.memory_space<vmem>>, vector<8x128xf32>
    %cst_13 = arith.constant 0.000000e+00 : f32
    %18 = vector.broadcast %cst_13 : f32 to vector<8x128xf32>
    %c0_i32_14 = arith.constant 0 : i32
    %c1_i32_15 = arith.constant 1 : i32
    %19 = arith.muli %c0_i32_14, %c1_i32_15 : i32
    %20 = tpu.assume_multiple %19, 1 : i32
    %21 = arith.index_cast %20 : i32 to index
    %c0_16 = arith.constant 0 : index
    %c0_17 = arith.constant 0 : index
    %22 = vector.load %arg4[%21, %c0_16, %c0_17] : memref<1x8x128xf32, #tpu.memory_space<vmem>>, vector<1x8x128xf32>
    %cst_18 = arith.constant 0.000000e+00 : f32
    %23 = vector.broadcast %cst_18 : f32 to vector<1x8x128xf32>
    %24 = arith.subf %23, %22 : vector<1x8x128xf32>
    %cst_19 = arith.constant 0.000000e+00 : f32
    %25 = vector.broadcast %cst_19 : f32 to vector<1x8x128xf32>
    %26 = arith.maximumf %24, %25 : vector<1x8x128xf32>
    %27 = math.absf %22 : vector<1x8x128xf32>
    %cst_20 = arith.constant 0.000000e+00 : f32
    %28 = vector.broadcast %cst_20 : f32 to vector<1x8x128xf32>
    %29 = arith.subf %28, %27 : vector<1x8x128xf32>
    %30 = math.exp %29 : vector<1x8x128xf32>
    %31 = math.log1p %30 : vector<1x8x128xf32>
    %32 = arith.addf %26, %31 : vector<1x8x128xf32>
    %cst_21 = arith.constant dense<0.000000e+00> : vector<8x128xf32>
    %33 = vector.multi_reduction <add>, %32, %cst_21 [0] : vector<1x8x128xf32> to vector<8x128xf32>
    %34 = arith.addf %18, %33 : vector<8x128xf32>
    %c1_i32_22 = arith.constant 1 : i32
    %35 = arith.addf %17, %34 : vector<8x128xf32>
    %c0_23 = arith.constant 0 : index
    %c0_24 = arith.constant 0 : index
    %36 = vector.load %arg8[%c0_23, %c0_24] : memref<8x128xf32, #tpu.memory_space<vmem>>, vector<8x128xf32>
    tpu.vector_store %arg8[%c0_23, %c0_24], %35 {strides = array<i32>} : memref<8x128xf32, #tpu.memory_space<vmem>>, vector<8x128xf32>,
    %c0_i32_25 = arith.constant 0 : i32
    %37 = arith.cmpi eq, %arg1, %c0_i32_25 : i32
    %38 = arith.extui %37 : i1 to i32
    %c0_i32_26 = arith.constant 0 : i32
    %39 = arith.cmpi ne, %38, %c0_i32_26 : i32
    scf.if %39 {
      %c0_27 = arith.constant 0 : index
      %c0_28 = arith.constant 0 : index
      %40 = vector.load %arg7[%c0_27, %c0_28] : memref<8x128xf32, #tpu.memory_space<vmem>>, vector<8x128xf32>
      %41 = vector.shape_cast %40 : vector<8x128xf32> to vector<1x8x128xf32>
      %c0_29 = arith.constant 0 : index
      %c0_30 = arith.constant 0 : index
      %c0_31 = arith.constant 0 : index
      %42 = vector.load %arg5[%c0_29, %c0_30, %c0_31] : memref<1x8x128xf32, #tpu.memory_space<vmem>>, vector<1x8x128xf32>
      tpu.vector_store %arg5[%c0_29, %c0_30, %c0_31], %41 {strides = array<i32>} : memref<1x8x128xf32, #tpu.memory_space<vmem>>, vector<1x8x128xf32>,
      %c0_32 = arith.constant 0 : index
      %c0_33 = arith.constant 0 : index
      %43 = vector.load %arg8[%c0_32, %c0_33] : memref<8x128xf32, #tpu.memory_space<vmem>>, vector<8x128xf32>
      %44 = vector.shape_cast %43 : vector<8x128xf32> to vector<1x8x128xf32>
      %c0_34 = arith.constant 0 : index
      %c0_35 = arith.constant 0 : index
      %c0_36 = arith.constant 0 : index
      %45 = vector.load %arg6[%c0_34, %c0_35, %c0_36] : memref<1x8x128xf32, #tpu.memory_space<vmem>>, vector<1x8x128xf32>
      tpu.vector_store %arg6[%c0_34, %c0_35, %c0_36], %44 {strides = array<i32>} : memref<1x8x128xf32, #tpu.memory_space<vmem>>, vector<1x8x128xf32>,
    } else {
    }
    return
  }
  func.func @transform_0(%arg0: i32, %arg1: i32) -> (i32, i32, i32) {
    %c1_i32 = arith.constant 1 : i32
    %0 = arith.muli %arg0, %c1_i32 : i32
    %1 = arith.addi %0, %arg1 : i32
    %c0_i32 = arith.constant 0 : i32
    %c0_i32_0 = arith.constant 0 : i32
    %c0_i32_1 = arith.constant 0 : i32
    return %1, %c0_i32, %c0_i32_0 : i32, i32, i32
  }
  func.func @transform_1(%arg0: i32, %arg1: i32) -> (i32, i32, i32) {
    %c1_i32 = arith.constant 1 : i32
    %0 = arith.muli %arg0, %c1_i32 : i32
    %1 = arith.addi %0, %arg1 : i32
    %c0_i32 = arith.constant 0 : i32
    %c0_i32_0 = arith.constant 0 : i32
    %c0_i32_1 = arith.constant 0 : i32
    return %1, %c0_i32, %c0_i32_0 : i32, i32, i32
  }
  func.func @transform_2(%arg0: i32, %arg1: i32) -> (i32, i32, i32) {
    %c1_i32 = arith.constant 1 : i32
    %0 = arith.muli %arg0, %c1_i32 : i32
    %1 = arith.addi %0, %arg1 : i32
    %c0_i32 = arith.constant 0 : i32
    %c0_i32_0 = arith.constant 0 : i32
    %c0_i32_1 = arith.constant 0 : i32
    return %1, %c0_i32, %c0_i32_0 : i32, i32, i32
  }
  func.func @transform_3(%arg0: i32, %arg1: i32) -> (i32, i32, i32) {
    %c0_i32 = arith.constant 0 : i32
    %c0_i32_0 = arith.constant 0 : i32
    %c0_i32_1 = arith.constant 0 : i32
    return %arg0, %c0_i32, %c0_i32_0 : i32, i32, i32
  }
  func.func @transform_4(%arg0: i32, %arg1: i32) -> (i32, i32, i32) {
    %c0_i32 = arith.constant 0 : i32
    %c0_i32_0 = arith.constant 0 : i32
    %c0_i32_1 = arith.constant 0 : i32
    return %arg0, %c0_i32, %c0_i32_0 : i32, i32, i32
  }
}

</mosaic_0001>

<bundles_post_ra>
// kernel: generator_loss.1
= control target key start
LH: loop header
LB: loop body
LE: loop exit
PB: predicated region body
PF: predicated region fallthrough
CT: control target
= control target key end

     0   :  { %s524_s15 = smov 0   ;;  %s526_s16 = smov 0   ;;  %s573_s0 = inlined_call_operand.vmem [shape: f32[2,8,128], index: 0, kind: input, shape index: {}]   ;;  %s574_s1 = inlined_call_operand.vmem [shape: f32[2,8,128], index: 1, kind: input, shape index: {}]   ;;  %s575_s2 = inlined_call_operand.vmem [shape: f32[2,8,128], index: 2, kind: input, shape index: {}]   ;;  %s576_s3 = inlined_call_operand.vmem [shape: f32[2,8,128], index: 3, kind: output, shape index: {0}]   ;;  %s577_s4 = inlined_call_operand.vmem [shape: f32[2,8,128], index: 4, kind: output, shape index: {1}]  }
   0x1   :  { %s528_s17 = smov 0  }
   0x2 LB: > { %s27_s18 = sadd.s32 1, %s493_s16  ;;  %p439_p0 = scmp.ge.s32.totalorder %s497_s17, 1  ;;  %s497_s17 = sphi %s528_s17, %s15_s17   ;;  %s493_s16 = sphi %s526_s16, %s579_s16   ;;  %s489_s15 = sphi %s524_s15, %s578_s15  }
   0x3   : > { %p29_p1 = scmp.ge.s32.totalorder %s27_s18, 2  ;;  %p206_p2 = scmp.lt.s32.totalorder %s497_s17, 3 }
   0x5   : > { %s581_s18 = smov (%p29_p1, %s27_s18), 0  ;;  %p207_p3 = pnand %p439_p0, %p206_p2 }
   0x6   : > { %p246_p4 = scmp.lt.s32.totalorder (!%p207_p3), %s489_s15, 1 }
   0x7   : > { %210 = sbr.rel (%p207_p3) target bundleno = 60 (0x3c), region = 32 }
   0xc   : > { %s583_s15 = smov (!%p246_p4, %s489_s15), 1 }
   0xd   : > { %s542_s19 = sshll.u32 %s583_s15, 3 }
   0xe   : > { %s249_s22 = scalar_lea.vmem %s573_s0, %s542_s19  ;;  %s255_s25 = scalar_lea.vmem %s574_s1, %s542_s19 }
   0xf   : > { %v280_v0 = vld [vmem:[%s249_s22] sm:$0xff]  ;;  %s261_s28 = scalar_lea.vmem %s575_s2, %s542_s19  ;;  %s266_s5 = scalar_lea.vmem %s576_s3, %s542_s19 }
  0x10   : > { %v282_v1 = vld [vmem:[%s255_s25] sm:$0xff]  ;;  %s270_s8 = scalar_lea.vmem %s577_s4, %s542_s19 }
  0x11   : > { %v283_v2 = vsub.f32 %v280_v0, %v282_v1  ;;  %v291_v3 = vld [vmem:[%s261_s28] sm:$0xff] }
  0x12   : > { %v294_v4 = vand.u32 2147483647, %v291_v3  ;;  %v292_v12 = vsub.f32 0.0, %v291_v3 }
  0x13   : > { %v284_v5 = vand.u32 2147483647, %v283_v2 }
  0x14   : > { %v295_v6 = vsub.f32 0.0, %v294_v4  ;;  %v293_v16 = vmax.f32 %v292_v12, 0.0 }
  0x15   : > { %316 = vst [vmem:[%s266_s5] sm:$0xff] %v284_v5 }
  0x16   : > { %v296_v7 = vmul.f32 1.442695, %v295_v6 }
  0x18   : > { %471 = vpow2.f32 %v296_v7 }
  0x25   : > { %v472_v8 = vpop.eup %471 }
  0x26   : > { %v298_v9 = vadd.f32 1.0, %v472_v8  ;;  %v301_v10 = vmul.f32 -0.5, %v472_v8  ;;  %v304_v13 = vand.u32 2147483647, %v472_v8 }
  0x28   : > { %473 = vlog2.f32 %v298_v9  ;;  %v302_v11 = vadd.f32 1.0, %v301_v10  ;;  %vm305_vm0 = vcmp.lt.f32.partialorder %v304_v13, 0.0004427343 }
  0x2a   : > { %v303_v14 = vmul.f32 %v472_v8, %v302_v11 }
  0x35   : > { %v474_v15 = vpop.eup %473 }
  0x36   : > { %v300_v17 = vmul.f32 0.6931472, %v474_v15 }
  0x38   : > { %v306_v18 = vsel %vm305_vm0, %v303_v14, %v300_v17 }
  0x39   : > { %v307_v19 = vadd.f32 %v306_v18, %v293_v16 }
  0x3b   : > { %318 = vst [vmem:[%s270_s8] sm:$0xff] %v307_v19 }
  0x3c PF: > { %s15_s17 = sadd.s32 1, %s497_s17   ;;  %s578_s15 = smov %s493_s16 }
  0x3d   : > { %p12_p5 = scmp.ge.s32.totalorder %s15_s17, 4   ;;  %s579_s16 = smov %s581_s18 }
  0x3f   :  { %14 = sbr.rel (!%p12_p5) target bundleno = 2 (0x2), region = 91 }

</bundles_post_ra>
